<compile_context>
chip_gen: v5e
topology: v5e:2x2
jax: 0.10.0
libtpu: 0.0.40
codegen_flags: <defaults>
</compile_context>

<pallas_src>
import functools
import math

import jax
import jax.numpy as jnp
from jax.experimental import pallas as pl
from jax.experimental.pallas import tpu as pltpu


def _fourvec_leaky_relu_e_kernel(x_ref, bias_ref, o_ref, *, negative_slope):
    # x_ref:    (TB, Wf)  lane-dense rows, Wf = g * num_vecs * 4 (multiple of 128)
    # bias_ref: (1, Wf)   bias on E lanes (lane % 4 == 0), zero elsewhere
    # o_ref:    (TB, Wf)
    xb = x_ref[...] + bias_ref[...]                      # only E lanes pick up bias

    lane = jax.lax.broadcasted_iota(jnp.int32, xb.shape, dimension=1)
    is_e = (lane & 3) == 0
    # 0/1 indicator: 1 on E lanes whose (E + bias) > 0, 0 everywhere else.
    ind = ((xb > 0) & is_e).astype(xb.dtype)

    # Spread each vector's indicator from its E lane to all 4 of its lanes via
    # three static lane rotations (XLU slot, effectively free next to the VPU).
    # Non-E lanes are zero in `ind`, so wrap-around contributions are zero ->
    # exact for any lane width and across folded batch-row boundaries.
    spread = ind
    spread = spread + pltpu.roll(ind, 1, axis=1)
    spread = spread + pltpu.roll(ind, 2, axis=1)
    spread = spread + pltpu.roll(ind, 3, axis=1)

    # factor == 1 where the vector's E > 0, negative_slope otherwise (exact).
    o_ref[...] = jnp.where(spread > 0.5, xb, negative_slope * xb)


def _choose_batch_tile(nrows, row_bytes, target_bytes=4 * 1024 * 1024):
    """Batch tile: ~target_bytes per block, multiple of 8 (or == nrows), and
    capped at ceil(nrows/2) so the parallel axis has >= 2 steps (v7x 2 TCs)."""
    if nrows <= 8:
        return int(nrows)
    tb = max(1, target_bytes // max(row_bytes, 1))
    tb = min(tb, pl.cdiv(nrows, 2))
    tb = max(8, (tb // 8) * 8)
    if tb >= nrows:
        return int(nrows)
    return int(tb)


def _fourvec_leaky_relu_e_pallas(x, bias, negative_slope):
    B, V, C = x.shape
    W = V * C
    itemsize = x.dtype.itemsize

    # Fold batch rows into lanes so the kernel lane width is a multiple of 128.
    g = 128 // math.gcd(W, 128)
    Bp = int(pl.cdiv(B, g)) * g
    x2 = x.reshape(B, W)
    if Bp != B:
        x2 = jnp.pad(x2, ((0, Bp - B), (0, 0)))          # padded rows dropped below
    nrows = Bp // g
    Wf = g * W
    x2 = x2.reshape(nrows, Wf)

    # (1, V, 1) -> (1, V, 4) with zeros in the momentum slots -> tiled to (1, Wf).
    bias_row = jnp.pad(bias.astype(x.dtype), ((0, 0), (0, 0), (0, 3))).reshape(1, W)
    bias_row = jnp.tile(bias_row, (1, g))

    tb = _choose_batch_tile(nrows, Wf * itemsize)
    grid = (int(pl.cdiv(nrows, tb)),)

    kernel = functools.partial(_fourvec_leaky_relu_e_kernel,
                               negative_slope=float(negative_slope))

    out = pl.pallas_call(
        kernel,
        out_shape=jax.ShapeDtypeStruct((nrows, Wf), x.dtype),
        grid_spec=pltpu.PrefetchScalarGridSpec(
            num_scalar_prefetch=0,
            grid=grid,
            in_specs=[
                pl.BlockSpec((tb, Wf), lambda b: (b, 0)),
                pl.BlockSpec((1, Wf), lambda b: (0, 0)),
            ],
            out_specs=pl.BlockSpec((tb, Wf), lambda b: (b, 0)),
        ),
        compiler_params=pltpu.CompilerParams(
            dimension_semantics=("parallel",),
            vmem_limit_bytes=48 * 1024 * 1024,
        ),
        cost_estimate=pl.CostEstimate(
            flops=12 * nrows * Wf,
            transcendentals=0,
            bytes_accessed=(2 * nrows * Wf + Wf) * itemsize,
        ),
    )(x2, bias_row)

    out = out.reshape(Bp, W)
    if Bp != B:
        out = out[:B]
    return out.reshape(B, V, C)


def fourvec_leaky_relu_e_ref(x, bias, negative_slope=0.01):
    """Pure-JAX reference mirroring the PyTorch forward exactly."""
    E = x[..., 0:1] + bias
    p = x[..., 1:]
    E_leaky = jnp.where(E > 0, E, negative_slope * E)
    p_scaled = jnp.where(E > 0, p, p * negative_slope)
    return jnp.concatenate([E_leaky, p_scaled], axis=-1)


def fourvec_leaky_relu_e(x, bias, negative_slope=0.01, *, force_pallas=False):
    """x: (B, V, 4), bias: (1, V, 1) -> (B, V, 4)."""
    B, V, C = x.shape
    assert C == 4
    assert bias.shape == (1, V, 1)

    tiny = x.size * x.dtype.itemsize < (1 << 20)   # kernel launch not worth it
    if tiny and not force_pallas:
        return fourvec_leaky_relu_e_ref(x, bias, negative_slope)
    return _fourvec_leaky_relu_e_pallas(x, bias, negative_slope)


if __name__ == "__main__":
    key = jax.random.PRNGKey(0)
    k1, k2 = jax.random.split(key)
    negative_slope = 0.01

    # Case 1: small shape consistent with the module (W = 64 -> folded to 128 lanes).
    B, num_vecs = 8, 16
    x = jax.random.normal(k1, (B, num_vecs, 4), dtype=jnp.float32)
    # Deterministic parameter init, same as the PyTorch module:
    # uniform_(bias, bound, bound) == constant fill with bound.
    bound = 1.0 / math.sqrt(num_vecs)
    bias = jnp.full((1, num_vecs, 1), bound, dtype=jnp.float32)

    out = fourvec_leaky_relu_e(x, bias, negative_slope, force_pallas=True)
    out = jax.block_until_ready(out)
    ref = fourvec_leaky_relu_e_ref(x, bias, negative_slope)
    assert out.shape == (B, num_vecs, 4)
    assert jnp.allclose(out, ref, atol=1e-6, rtol=1e-6), "mismatch vs reference (case 1)"

    # Case 2: exercises batch padding + lane folding (W = 20, g = 32, Wf = 640).
    B2, num_vecs2 = 6, 5
    x2 = jax.random.normal(k2, (B2, num_vecs2, 4), dtype=jnp.float32)
    bias2 = jnp.full((1, num_vecs2, 1), 1.0 / math.sqrt(num_vecs2), dtype=jnp.float32)
    out2 = fourvec_leaky_relu_e(x2, bias2, negative_slope, force_pallas=True)
    out2 = jax.block_until_ready(out2)
    ref2 = fourvec_leaky_relu_e_ref(x2, bias2, negative_slope)
    assert out2.shape == (B2, num_vecs2, 4)
    assert jnp.allclose(out2, ref2, atol=1e-6, rtol=1e-6), "mismatch vs reference (case 2)"

    print("KERNEL_OK")
</pallas_src>

<mosaic_0001>
module attributes {stable_mosaic.version = 11 : i64} {
  func.func @_fourvec_leaky_relu_e_kernel(%arg0: i32, %arg1: memref<4x128xf32, #tpu.memory_space<vmem>>, %arg2: memref<1x128xf32, #tpu.memory_space<vmem>>, %arg3: memref<4x128xf32, #tpu.memory_space<vmem>>) attributes {dimension_semantics = [#tpu.dimension_semantics<parallel>], iteration_bounds = array<i64: 1>, scalar_prefetch = 0 : i64, scratch_operands = 0 : i64, tpu.core_type = #tpu.core_type<tc>, window_params = [{transform_indices = @transform_0, window_bounds = array<i64: 4, 128>}, {pipeline_mode = #tpu.pipeline_mode<synchronous>, transform_indices = @transform_1, window_bounds = array<i64: 1, 128>}, {transform_indices = @transform_2, window_bounds = array<i64: 4, 128>}]} {
    %c0 = arith.constant 0 : index
    %c0_0 = arith.constant 0 : index
    %0 = vector.load %arg1[%c0, %c0_0] : memref<4x128xf32, #tpu.memory_space<vmem>>, vector<4x128xf32>
    %c0_1 = arith.constant 0 : index
    %c0_2 = arith.constant 0 : index
    %1 = vector.load %arg2[%c0_1, %c0_2] : memref<1x128xf32, #tpu.memory_space<vmem>>, vector<1x128xf32>
    %2 = vector.broadcast %1 : vector<1x128xf32> to vector<4x128xf32>
    %3 = arith.addf %0, %2 : vector<4x128xf32>
    %4 = tpu.iota {dimensions = array<i32: 1>} : vector<4x128xi32>
    %c3_i32 = arith.constant 3 : i32
    %5 = vector.broadcast %c3_i32 : i32 to vector<4x128xi32>
    %6 = arith.andi %4, %5 : vector<4x128xi32>
    %c0_i32 = arith.constant 0 : i32
    %7 = vector.broadcast %c0_i32 : i32 to vector<4x128xi32>
    %8 = arith.cmpi eq, %6, %7 : vector<4x128xi32>
    %cst = arith.constant 0.000000e+00 : f32
    %9 = vector.broadcast %cst : f32 to vector<4x128xf32>
    %10 = arith.cmpf ogt, %3, %9 : vector<4x128xf32>
    %11 = arith.andi %10, %8 : vector<4x128xi1>
    %12 = arith.extui %11 : vector<4x128xi1> to vector<4x128xi32>
    %13 = arith.sitofp %12 : vector<4x128xi32> to vector<4x128xf32>
    %c1_i32 = arith.constant 1 : i32
    %14 = tpu.dynamic_rotate %13 by %c1_i32 dim 1 : vector<4x128xf32>, i32 -> vector<4x128xf32>
    %15 = arith.addf %13, %14 : vector<4x128xf32>
    %c2_i32 = arith.constant 2 : i32
    %16 = tpu.dynamic_rotate %13 by %c2_i32 dim 1 : vector<4x128xf32>, i32 -> vector<4x128xf32>
    %17 = arith.addf %15, %16 : vector<4x128xf32>
    %c3_i32_3 = arith.constant 3 : i32
    %18 = tpu.dynamic_rotate %13 by %c3_i32_3 dim 1 : vector<4x128xf32>, i32 -> vector<4x128xf32>
    %19 = arith.addf %17, %18 : vector<4x128xf32>
    %cst_4 = arith.constant 5.000000e-01 : f32
    %20 = vector.broadcast %cst_4 : f32 to vector<4x128xf32>
    %21 = arith.cmpf ogt, %19, %20 : vector<4x128xf32>
    %cst_5 = arith.constant 0.00999999977 : f32
    %22 = vector.broadcast %cst_5 : f32 to vector<4x128xf32>
    %23 = arith.mulf %22, %3 : vector<4x128xf32>
    %24 = arith.select %21, %3, %23 : vector<4x128xi1>, vector<4x128xf32>
    %c0_6 = arith.constant 0 : index
    %c0_7 = arith.constant 0 : index
    %25 = vector.load %arg3[%c0_6, %c0_7] : memref<4x128xf32, #tpu.memory_space<vmem>>, vector<4x128xf32>
    tpu.vector_store %arg3[%c0_6, %c0_7], %24 {strides = array<i32>} : memref<4x128xf32, #tpu.memory_space<vmem>>, vector<4x128xf32>,
    return
  }
  func.func @transform_0(%arg0: i32) -> (i32, i32) {
    %c0_i32 = arith.constant 0 : i32
    %c0_i32_0 = arith.constant 0 : i32
    return %arg0, %c0_i32 : i32, i32
  }
  func.func @transform_1(%arg0: i32) -> (i32, i32) {
    %c0_i32 = arith.constant 0 : i32
    %c0_i32_0 = arith.constant 0 : i32
    %c0_i32_1 = arith.constant 0 : i32
    return %c0_i32, %c0_i32_0 : i32, i32
  }
  func.func @transform_2(%arg0: i32) -> (i32, i32) {
    %c0_i32 = arith.constant 0 : i32
    %c0_i32_0 = arith.constant 0 : i32
    return %arg0, %c0_i32 : i32, i32
  }
}

</mosaic_0001>

<bundles_post_ra>
// kernel: tpu_custom_call.1
= control target key start
LH: loop header
LB: loop body
LE: loop exit
PB: predicated region body
PF: predicated region fallthrough
CT: control target
= control target key end

     0   :  { %7 = vsyncpa [#allocation3], 0  ;;  %s203_s0 = inlined_call_operand.hbm [shape: f32[4,128], index: 0, kind: input, shape index: {}]   ;;  %s204_s1 = inlined_call_operand.hbm [shape: f32[1,128], index: 1, kind: input, shape index: {}]   ;;  %s205_s2 = inlined_call_operand.hbm [shape: f32[4,128], index: 2, kind: output, shape index: {}]  }
   0x1   :  { %8 = vsyncpa [#allocation6], 0 }
   0x2   :  { %9 = vsyncpa [#allocation4], 0  ;;  %s15_s11 = sshll.u32 %s203_s0, 4  ;;  %s172_s12 = smov [#allocation2]   ;;  %s16_s11 = int_to_ptr.hbm [resolvable:$true] %s15_s11 }
   0x3   :  { %s17_s13 = sshll.u32 %s172_s12, 4  ;;  %s26_s16 = sshll.u32 %s204_s1, 4  ;;  %s18_s13 = int_to_ptr.vmem [resolvable:$true] %s17_s13  ;;  %s27_s16 = int_to_ptr.hbm [resolvable:$true] %s26_s16 }
   0x4   :  { %20 = dma.hbm_to_vmem [thread:$0]  %s16_s11, 64, %s18_s13, [#allocation3]  }
   0x5   :  { %s173_s17 = smov [#allocation5]  }
   0x6   :  { %s28_s18 = sshll.u32 %s173_s17, 4  ;;  %s29_s18 = int_to_ptr.vmem [resolvable:$true] %s28_s18 }
   0x7   :  { %31 = dma.hbm_to_vmem [thread:$0]  %s27_s16, 16, %s29_s18, [#allocation6]  }
   0x8   :  { %166 = dma.done.wait [#allocation3], 64  }
   0x9   :  { %167 = vsyncadd [#allocation3], 4294967232 }
   0xa   :  { %168 = dma.done.wait [#allocation6], 16  }
   0xb   :  { %169 = vsyncadd [#allocation6], 4294967280  ;;  %v46_v0 = vlaneseq  ;;  %v40_v3 = vld [vmem:[#allocation2] sm:$0xf]  ;;  %v93_v4 = vld [vmem:[#allocation5] ss:$0 sm:$0xff] }
   0xc   :  { %v45_v5 = vadd.f32 %v93_v4, %v40_v3  ;;  %v174_v6 = vmov 0.0   ;;  %s175_s0 = smov 1   ;;  %s176_s1 = smov 3  }
   0xd   :  { %v47_v1 = vand.u32 127, %v46_v0  ;;  %s177_s19 = smov 2   ;;  %s178_s20 = smov [#allocation7]  }
   0xe   :  { %vm50_vm1 = vcmp.gt.f32.partialorder %v45_v5, 0.0  ;;  %v64_v13 = vmul.f32 0.01, %v45_v5  ;;  %s72_s21 = sshll.u32 %s178_s20, 4  ;;  %s74_s24 = sshll.u32 %s205_s2, 4  ;;  %s73_s21 = int_to_ptr.vmem [resolvable:$true] %s72_s21  ;;  %s75_s24 = int_to_ptr.hbm [resolvable:$true] %s74_s24 }
   0xf   :  { %v48_v2 = vand.u32 3, %v47_v1 }
  0x11   :  { %vm49_vm0 = vcmp.eq.s32.totalorder %v48_v2, 0 }
  0x12   :  { %vm51_vm2 = vmand %vm50_vm1, %vm49_vm0 }
  0x13   :  { %v85_v7 = vsel %vm51_vm2, 1.0, %v174_v6 }
  0x14   :  { %54 = vrot.lane.b32.xlu0 %v85_v7, %s175_s0  ;;  %60 = vrot.lane.b32.xlu1 %v85_v7, %s176_s1 }
  0x1c   :  { %57 = vrot.lane.b32.xlu0 %v85_v7, %s177_s19 }
  0x86   :  { %v55_v8 = vpop.permute.xlu0 %54  ;;  %v61_v11 = vpop.permute.xlu1 %60 }
  0x87   :  { %v56_v9 = vadd.f32 %v85_v7, %v55_v8 }
  0x8e   :  { %v58_v10 = vpop.permute.xlu0 %57 }
  0x8f   :  { %v59_v12 = vadd.f32 %v58_v10, %v56_v9 }
  0x91   :  { %v62_v14 = vadd.f32 %v61_v11, %v59_v12 }
  0x93   :  { %vm63_vm3 = vcmp.gt.f32.partialorder %v62_v14, 0.5 }
  0x94   :  { %v65_v15 = vsel %vm63_vm3, %v45_v5, %v64_v13 }
  0x95   :  { %66 = vst [vmem:[#allocation7] sm:$0xf] %v65_v15 }
  0x96   :  { %77 = dma.vmem_to_hbm [thread:$0]  %s73_s21, 64, %s75_s24, [#allocation4]  }
  0x97   :  { %170 = dma.done.wait [#allocation4], 64  }
  0x98   :  { %171 = vsyncadd [#allocation4], 4294967232 }
  0x99   :  { %82 = vsyncpa [#allocation3], 1 }
  0x9a   :  { %83 = vsyncpa [#allocation6], 1 }
  0x9b   :  { %84 = vsyncpa [#allocation4], 1 }

</bundles_post_ra>
